<compile_context>
chip_gen: v6e
topology: v6e:2x2x1
jax: 0.10.0
libtpu: 0.0.40
codegen_flags: <defaults>
</compile_context>

<pallas_src>
import math

import jax
import jax.numpy as jnp
from jax.experimental import pallas as pl
from jax.experimental.pallas import tpu as pltpu

LOG_SQRT_2PI = 0.5 * math.log(2.0 * math.pi)
LOG_2 = math.log(2.0)


# ---------------------------------------------------------------------------
# layout helpers
# ---------------------------------------------------------------------------
def _head_layout(action_dim: int):
    """(ls_offset, head_width, out_lanes) for the fused mu|log_sigma head.

    For A <= 63 the head packs into a single 128-lane MXU group (log_sigma at
    lane offset 64).  The output slab is `out_lanes` wide; action occupies
    lanes [0:A] and log_prob lane out_lanes-1.
    """
    if action_dim <= 63:
        return 64, 128, 128
    pad = ((action_dim + 1 + 127) // 128) * 128   # reserve the log_prob lane
    return pad, 2 * pad, pad


def _device_kind() -> str:
    try:
        return jax.devices()[0].device_kind.lower()
    except Exception:
        return ""


def _resolve_matmul_dtype(matmul_dtype):
    if not (isinstance(matmul_dtype, str) and matmul_dtype == "auto"):
        return matmul_dtype
    kind = _device_kind()
    # v5e MXU is bf16-native; f32 matmuls are multi-pass emulation there.
    if "v5 lite" in kind or "v5e" in kind or "v5litepod" in kind:
        return jnp.bfloat16
    return None


def _resolve_bf16_trunk(bf16_trunk, matmul_dtype):
    if matmul_dtype is None:
        return False
    if bf16_trunk is not None:
        return bool(bf16_trunk)
    kind = _device_kind()
    # v6e/v7x have a bf16 VALU: carry trunk activations in bf16.  v5e does
    # not, so keep elementwise math in f32 there.
    return "v5" not in kind


def _pick_tile_b(batch: int, per_row_bytes: int) -> int:
    """Batch tile: >=2 tiles when B >= 16 (v7x: 2 TCs), <=2048 rows, VMEM-capped."""
    if batch < 16:
        return batch
    cap = min(2048, max(8, (24 << 20) // max(per_row_bytes, 1)), batch // 2)
    cap -= cap % 8
    for t in range(max(cap, 8), 7, -8):
        if batch % t == 0:
            return t
    return batch   # no sublane-friendly divisor -> one full-batch tile


def _vmem_limit_bytes(weight_args, tile_b, state_dim, hidden_dim, head_width,
                      out_lanes, deterministic):
    wbytes = sum(int(w.size) * w.dtype.itemsize for w in weight_args)
    stream = 2 * 4 * tile_b * (state_dim + out_lanes +
                               (0 if deterministic else out_lanes))
    scratch = 8 * 4 * tile_b * max(hidden_dim, head_width)
    total = 2 * wbytes + stream + scratch          # conservative: 2x weight bufs
    return int(min(64 << 20, max(32 << 20, 2 * total + (4 << 20))))


# ---------------------------------------------------------------------------
# kernel
# ---------------------------------------------------------------------------
def _make_actor_kernel(*, action_dim, ls_offset, head_width, out_lanes, max_action,
                       deterministic, need_log_prob, matmul_dtype, trunk_bf16,
                       stable_tanh_log):
    A = action_dim
    trunk_dtype = jnp.bfloat16 if trunk_bf16 else jnp.float32

    def dense(x, w_ref, b_ref, *, relu):
        if matmul_dtype is not None and x.dtype != jnp.dtype(matmul_dtype):
            x = x.astype(matmul_dtype)
        y = jnp.dot(x, w_ref[...], preferred_element_type=jnp.float32)
        y = y + b_ref[...]                      # bias add in f32
        if relu:
            y = jnp.maximum(y, 0.0)
            if trunk_dtype != jnp.float32:
                y = y.astype(trunk_dtype)       # bf16 trunk carry (v6e/v7x)
        return y

    def kernel(*refs):
        it = iter(refs)
        x_ref = next(it)
        eps_ref = None if deterministic else next(it)
        w1, b1, w2, b2, w3, b3, wh, bh = (next(it) for _ in range(8))
        out_ref = next(it)

        # trunk: 3x (Linear -> ReLU)
        h = dense(x_ref[...], w1, b1, relu=True)
        h = dense(h, w2, b2, relu=True)
        h = dense(h, w3, b3, relu=True)

        # fused mu|log_sigma head (f32 result).
        head = dense(h, wh, bh, relu=False)                 # (tb, head_width)

        # Full 128-lane views: mu lanes [0:A] valid, padding lanes are exact
        # zeros (zero weight/bias columns); lanes >= A of the output slab are
        # don't-care except the last lane, which carries log_prob.
        mu = head[:, :out_lanes]
        if ls_offset % out_lanes == 0 and ls_offset + out_lanes <= head_width:
            ls = head[:, ls_offset:ls_offset + out_lanes]
        else:
            # packed 128-lane head: rotate log_sigma so it lane-aligns with mu
            # (XLU slot, has slack; shift == 64 so rotation direction is moot).
            ls = pltpu.roll(head, (head_width - ls_offset) % head_width, 1)
        log_sigma = jnp.clip(ls, -5.0, 2.0)

        if deterministic:
            eps = None
            action = mu
        else:
            eps = eps_ref[...]                              # zero-padded lanes
            action = mu + jnp.exp(log_sigma) * eps          # rsample

        tanh_action = jnp.tanh(action)
        slab = tanh_action * max_action                     # (tb, out_lanes)

        if need_log_prob:
            # Normal(mu, sigma).log_prob(action): z = (action - mu)/sigma == eps
            # (== 0 on the deterministic path), so no divide is needed.
            gauss = -log_sigma - LOG_SQRT_2PI
            if not deterministic:
                gauss = gauss - 0.5 * (eps * eps)
            if stable_tanh_log:
                # log(1 - tanh(a)^2) = 2*(log 2 - a - softplus(-2a)), stable
                t = -2.0 * action
                softplus = jnp.maximum(t, 0.0) + jnp.log(1.0 + jnp.exp(-jnp.abs(t)))
                corr = 2.0 * (LOG_2 - action - softplus)
            else:
                # matches the PyTorch module exactly
                corr = jnp.log(1.0 - tanh_action * tanh_action + 1e-6)
            col = jax.lax.broadcasted_iota(jnp.int32, slab.shape, 1)
            terms = jnp.where(col < A, gauss - corr, 0.0)
            logp = jnp.sum(terms, axis=-1, keepdims=True)   # (tb, 1)
            slab = jnp.where(col == out_lanes - 1,
                             jnp.broadcast_to(logp, slab.shape), slab)

        out_ref[...] = slab.astype(out_ref.dtype)           # one dense 128-lane store

    return kernel


# ---------------------------------------------------------------------------
# wrapper
# ---------------------------------------------------------------------------
def actor_forward(state, eps, params, *, max_action=1.0, deterministic=False,
                  need_log_prob=False, matmul_dtype="auto", bf16_trunk=None,
                  stable_tanh_log=False, tile_b=None):
    """Pallas equivalent of Actor.forward.

    Returns (tanh(action) * max_action, log_prob | None).  `eps` is the
    externally drawn N(0,1) rsample noise; ignored (and not DMA'd) when
    deterministic=True.
    """
    B, state_dim = state.shape
    A = params["wmu"].shape[1]
    hidden_dim = params["w1"].shape[1]
    ls_offset, head_width, out_lanes = _head_layout(A)
    assert params["wh"].shape == (hidden_dim, head_width)

    matmul_dtype = _resolve_matmul_dtype(matmul_dtype)
    trunk_bf16 = _resolve_bf16_trunk(bf16_trunk, matmul_dtype)

    if tile_b is None:
        per_row = 4 * (state_dim + 3 * hidden_dim + head_width + 2 * out_lanes)
        tile_b = _pick_tile_b(B, per_row)
    if B % tile_b != 0:
        tile_b = B
    num_tiles = B // tile_b

    w1, w2, w3, wh = params["w1"], params["w2"], params["w3"], params["wh"]
    if matmul_dtype is not None:
        # cast matmul weights once here (halves weight HBM->VMEM traffic);
        # biases stay f32 and are added to the f32 MXU accumulation.
        w1, w2, w3, wh = (w.astype(matmul_dtype) for w in (w1, w2, w3, wh))
    weight_args = [w1, params["b1"], w2, params["b2"], w3, params["b3"],
                   wh, params["bh"]]

    args = [state.astype(jnp.float32)]
    data_specs = [pl.BlockSpec((tile_b, state_dim), lambda i: (i, 0))]
    if not deterministic:
        if eps is None:
            raise ValueError("eps (N(0,1) noise) is required when deterministic=False")
        # densify eps to the 128-lane slab width so its loads are unmasked;
        # zero padding keeps the padded action lanes at exactly 0.
        # TODO(synk): optionally generate eps in-kernel (pltpu.prng_seed +
        # pltpu.stateful_normal) to drop this HBM stream; changes RNG semantics.
        eps_p = jnp.pad(eps.astype(jnp.float32), ((0, 0), (0, out_lanes - A)))
        args.append(eps_p)
        data_specs.append(pl.BlockSpec((tile_b, out_lanes), lambda i: (i, 0)))
    args += weight_args

    vmem_limit = _vmem_limit_bytes(weight_args, tile_b, state_dim, hidden_dim,
                                   head_width, out_lanes, deterministic)

    kernel = _make_actor_kernel(
        action_dim=A, ls_offset=ls_offset, head_width=head_width,
        out_lanes=out_lanes, max_action=float(max_action),
        deterministic=bool(deterministic), need_log_prob=bool(need_log_prob),
        matmul_dtype=matmul_dtype, trunk_bf16=trunk_bf16,
        stable_tanh_log=bool(stable_tanh_log))

    def run(single_buffer_weights):
        if single_buffer_weights:
            # constant index_map -> double buffering is pure VMEM waste
            w_specs = [pl.BlockSpec(w.shape, lambda i: (0, 0),
                                    pipeline_mode=pl.Buffered(1))
                       for w in weight_args]
        else:
            w_specs = [pl.BlockSpec(w.shape, lambda i: (0, 0)) for w in weight_args]
        return pl.pallas_call(
            kernel,
            out_shape=jax.ShapeDtypeStruct((B, out_lanes), jnp.float32),
            grid=(num_tiles,),
            in_specs=data_specs + w_specs,
            out_specs=pl.BlockSpec((tile_b, out_lanes), lambda i: (i, 0)),
            compiler_params=pltpu.CompilerParams(
                dimension_semantics=("parallel",),
                vmem_limit_bytes=vmem_limit),
        )(*args)

    try:
        out = run(True)          # single-buffered, VMEM-resident weights
    except Exception:            # pragma: no cover - older jax w/o pipeline_mode
        out = run(False)         # fall back to default double-buffered specs

    action = out[:, :A]
    if need_log_prob:
        return action, out[:, out_lanes - 1]
    return action, None


# ---------------------------------------------------------------------------
# parameters & pure-JAX reference
# ---------------------------------------------------------------------------
def init_actor_params(key, state_dim, action_dim, hidden_dim):
    """Deterministic synthetic parameters mirroring Actor.__init__ shapes/inits."""
    # TODO(synk): original module loads weights from models/3.pt; synthetic init here.
    ks = jax.random.split(key, 7)

    def trunk_linear(k, fan_in, fan_out):
        bound = 1.0 / math.sqrt(fan_in)           # PyTorch nn.Linear default range
        return jax.random.uniform(k, (fan_in, fan_out), jnp.float32, -bound, bound)

    wmu = jax.random.uniform(ks[3], (hidden_dim, action_dim), jnp.float32, -1e-3, 1e-3)
    bmu = jax.random.uniform(ks[4], (1, action_dim), jnp.float32, -1e-3, 1e-3)
    wls = jax.random.uniform(ks[5], (hidden_dim, action_dim), jnp.float32, -1e-3, 1e-3)
    bls = jax.random.uniform(ks[6], (1, action_dim), jnp.float32, -1e-3, 1e-3)

    # fused mu|log_sigma head: log_sigma columns at lane offset ls_offset,
    # everything else exactly zero (the kernel relies on the zero padding).
    ls_offset, head_width, _ = _head_layout(action_dim)
    wh = jnp.zeros((hidden_dim, head_width), jnp.float32)
    wh = wh.at[:, :action_dim].set(wmu).at[:, ls_offset:ls_offset + action_dim].set(wls)
    bh = jnp.zeros((1, head_width), jnp.float32)
    bh = bh.at[:, :action_dim].set(bmu).at[:, ls_offset:ls_offset + action_dim].set(bls)

    return {
        "w1": trunk_linear(ks[0], state_dim, hidden_dim),
        "b1": jnp.full((1, hidden_dim), 0.1, jnp.float32),   # constant_(bias, 0.1)
        "w2": trunk_linear(ks[1], hidden_dim, hidden_dim),
        "b2": jnp.full((1, hidden_dim), 0.1, jnp.float32),
        "w3": trunk_linear(ks[2], hidden_dim, hidden_dim),
        "b3": jnp.full((1, hidden_dim), 0.1, jnp.float32),
        "wmu": wmu, "bmu": bmu, "wls": wls, "bls": bls,       # reference impl
        "wh": wh, "bh": bh,                                   # fused head for kernel
    }


def actor_forward_ref(state, eps, params, *, max_action=1.0, deterministic=False):
    """Pure-JAX reference of the same forward for validation."""
    h = jnp.maximum(state @ params["w1"] + params["b1"], 0.0)
    h = jnp.maximum(h @ params["w2"] + params["b2"], 0.0)
    h = jnp.maximum(h @ params["w3"] + params["b3"], 0.0)
    mu = h @ params["wmu"] + params["bmu"]
    log_sigma = jnp.clip(h @ params["wls"] + params["bls"], -5.0, 2.0)
    sigma = jnp.exp(log_sigma)
    action = mu if deterministic else mu + sigma * eps
    tanh_action = jnp.tanh(action)
    z = (action - mu) / sigma
    logp = jnp.sum(-0.5 * z * z - log_sigma - LOG_SQRT_2PI, axis=-1)
    logp = logp - jnp.sum(jnp.log(1.0 - tanh_action ** 2 + 1e-6), axis=-1)
    return tanh_action * max_action, logp


# ---------------------------------------------------------------------------
# self-test
# ---------------------------------------------------------------------------
if __name__ == "__main__":
    B, STATE_DIM, ACTION_DIM, HIDDEN_DIM = 8, 16, 8, 32
    MAX_ACTION = 1.0

    key = jax.random.PRNGKey(0)
    k_params, k_state, k_eps, k_state2, k_eps2 = jax.random.split(key, 5)

    params = init_actor_params(k_params, STATE_DIM, ACTION_DIM, HIDDEN_DIM)
    state = jax.random.normal(k_state, (B, STATE_DIM), jnp.float32)
    eps = jax.random.normal(k_eps, (B, ACTION_DIM), jnp.float32)   # rsample noise

    ref_action, ref_logp = actor_forward_ref(state, eps, params,
                                             max_action=MAX_ACTION, deterministic=False)
    ref_det_action, _ = actor_forward_ref(state, eps, params,
                                          max_action=MAX_ACTION, deterministic=True)

    # 1) stochastic path with log_prob (strict f32 matmuls)
    action, log_prob = actor_forward(state, eps, params, max_action=MAX_ACTION,
                                     deterministic=False, need_log_prob=True,
                                     matmul_dtype=None)
    action = jax.block_until_ready(action)
    assert action.shape == (B, ACTION_DIM) and log_prob.shape == (B,)
    assert jnp.allclose(action, ref_action, atol=1e-5, rtol=1e-5)
    assert jnp.allclose(log_prob, ref_logp, atol=1e-4, rtol=1e-4)

    # 2) deterministic act() path: no eps input, no log_prob work
    det_action, det_none = actor_forward(state, None, params, max_action=MAX_ACTION,
                                         deterministic=True, need_log_prob=False,
                                         matmul_dtype=None)
    det_action = jax.block_until_ready(det_action)
    assert det_none is None
    assert jnp.allclose(det_action, ref_det_action, atol=1e-5, rtol=1e-5)

    # 3) larger batch exercises the multi-tile "parallel" grid (1024 -> 2x512)
    B2 = 1024
    state2 = jax.random.normal(k_state2, (B2, STATE_DIM), jnp.float32)
    eps2 = jax.random.normal(k_eps2, (B2, ACTION_DIM), jnp.float32)
    action2, log_prob2 = actor_forward(state2, eps2, params, max_action=MAX_ACTION,
                                       deterministic=False, need_log_prob=True,
                                       matmul_dtype=None)
    action2 = jax.block_until_ready(action2)
    ref_action2, ref_logp2 = actor_forward_ref(state2, eps2, params,
                                               max_action=MAX_ACTION, deterministic=False)
    assert action2.shape == (B2, ACTION_DIM) and log_prob2.shape == (B2,)
    assert jnp.allclose(action2, ref_action2, atol=1e-5, rtol=1e-5)
    assert jnp.allclose(log_prob2, ref_logp2, atol=1e-4, rtol=1e-4)

    # 4) bf16 matmul operands + bf16 trunk activations (v6e/v7x path): loose check
    a_bf16, lp_bf16 = actor_forward(state, eps, params, max_action=MAX_ACTION,
                                    deterministic=False, need_log_prob=True,
                                    matmul_dtype=jnp.bfloat16, bf16_trunk=True)
    a_bf16 = jax.block_until_ready(a_bf16)
    assert jnp.allclose(a_bf16, ref_action, atol=5e-2, rtol=5e-2)
    assert bool(jnp.all(jnp.isfinite(lp_bf16)))

    # 5) device-default matmul dtype (bf16 on v5e, f32 elsewhere)
    auto_dtype = _resolve_matmul_dtype("auto")
    tol = 5e-2 if auto_dtype is not None else 1e-4
    a_auto, lp_auto = actor_forward(state, eps, params, max_action=MAX_ACTION,
                                    deterministic=False, need_log_prob=True)
    a_auto = jax.block_until_ready(a_auto)
    assert jnp.allclose(a_auto, ref_action, atol=tol, rtol=tol)
    assert jnp.allclose(lp_auto, ref_logp, atol=10 * tol, rtol=10 * tol)

    # 6) numerically-stable tanh correction (optional; default matches torch)
    a_st, lp_st = actor_forward(state, eps, params, max_action=MAX_ACTION,
                                deterministic=False, need_log_prob=True,
                                matmul_dtype=None, stable_tanh_log=True)
    a_st = jax.block_until_ready(a_st)
    assert jnp.allclose(a_st, ref_action, atol=1e-5, rtol=1e-5)
    assert jnp.allclose(lp_st, ref_logp, atol=1e-3, rtol=1e-3)

    print("KERNEL_OK")
</pallas_src>

<mosaic_0001>
module attributes {stable_mosaic.version = 11 : i64} {
  func.func @kernel(%arg0: i32, %arg1: memref<8x16xf32, #tpu.memory_space<vmem>>, %arg2: memref<8x128xf32, #tpu.memory_space<vmem>>, %arg3: memref<16x32xf32, #tpu.memory_space<vmem>>, %arg4: memref<1x32xf32, #tpu.memory_space<vmem>>, %arg5: memref<32x32xf32, #tpu.memory_space<vmem>>, %arg6: memref<1x32xf32, #tpu.memory_space<vmem>>, %arg7: memref<32x32xf32, #tpu.memory_space<vmem>>, %arg8: memref<1x32xf32, #tpu.memory_space<vmem>>, %arg9: memref<32x128xf32, #tpu.memory_space<vmem>>, %arg10: memref<1x128xf32, #tpu.memory_space<vmem>>, %arg11: memref<8x128xf32, #tpu.memory_space<vmem>>) attributes {dimension_semantics = [#tpu.dimension_semantics<parallel>], iteration_bounds = array<i64: 1>, scalar_prefetch = 0 : i64, scratch_operands = 0 : i64, tpu.core_type = #tpu.core_type<tc>, window_params = [{transform_indices = @transform_0, window_bounds = array<i64: 8, 16>}, {transform_indices = @transform_1, window_bounds = array<i64: 8, 128>}, {pipeline_mode = #tpu.pipeline_mode<synchronous>, transform_indices = @transform_2, window_bounds = array<i64: 16, 32>}, {pipeline_mode = #tpu.pipeline_mode<synchronous>, transform_indices = @transform_3, window_bounds = array<i64: 1, 32>}, {pipeline_mode = #tpu.pipeline_mode<synchronous>, transform_indices = @transform_4, window_bounds = array<i64: 32, 32>}, {pipeline_mode = #tpu.pipeline_mode<synchronous>, transform_indices = @transform_5, window_bounds = array<i64: 1, 32>}, {pipeline_mode = #tpu.pipeline_mode<synchronous>, transform_indices = @transform_6, window_bounds = array<i64: 32, 32>}, {pipeline_mode = #tpu.pipeline_mode<synchronous>, transform_indices = @transform_7, window_bounds = array<i64: 1, 32>}, {pipeline_mode = #tpu.pipeline_mode<synchronous>, transform_indices = @transform_8, window_bounds = array<i64: 32, 128>}, {pipeline_mode = #tpu.pipeline_mode<synchronous>, transform_indices = @transform_9, window_bounds = array<i64: 1, 128>}, {transform_indices = @transform_10, window_bounds = array<i64: 8, 128>}]} {
    %c0 = arith.constant 0 : index
    %c0_0 = arith.constant 0 : index
    %0 = vector.load %arg1[%c0, %c0_0] : memref<8x16xf32, #tpu.memory_space<vmem>>, vector<8x16xf32>
    %c0_1 = arith.constant 0 : index
    %c0_2 = arith.constant 0 : index
    %1 = vector.load %arg3[%c0_1, %c0_2] : memref<16x32xf32, #tpu.memory_space<vmem>>, vector<16x32xf32>
    %cst = arith.constant dense<0.000000e+00> : vector<8x32xf32>
    %2 = tpu.matmul %0, %1, %cst {dimension_numbers = #tpu.dot_dimension_numbers<[1], [0], [0], [1], [0, 0, 1, 1], [], []>} : vector<8x16xf32>, vector<16x32xf32>, vector<8x32xf32> -> vector<8x32xf32>
    %c0_3 = arith.constant 0 : index
    %c0_4 = arith.constant 0 : index
    %3 = vector.load %arg4[%c0_3, %c0_4] : memref<1x32xf32, #tpu.memory_space<vmem>>, vector<1x32xf32>
    %4 = vector.broadcast %3 : vector<1x32xf32> to vector<8x32xf32>
    %5 = arith.addf %2, %4 : vector<8x32xf32>
    %cst_5 = arith.constant 0.000000e+00 : f32
    %6 = vector.broadcast %cst_5 : f32 to vector<8x32xf32>
    %7 = arith.maximumf %5, %6 : vector<8x32xf32>
    %c0_6 = arith.constant 0 : index
    %c0_7 = arith.constant 0 : index
    %8 = vector.load %arg5[%c0_6, %c0_7] : memref<32x32xf32, #tpu.memory_space<vmem>>, vector<32x32xf32>
    %cst_8 = arith.constant dense<0.000000e+00> : vector<8x32xf32>
    %9 = tpu.matmul %7, %8, %cst_8 {dimension_numbers = #tpu.dot_dimension_numbers<[1], [0], [0], [1], [0, 0, 1, 1], [], []>} : vector<8x32xf32>, vector<32x32xf32>, vector<8x32xf32> -> vector<8x32xf32>
    %c0_9 = arith.constant 0 : index
    %c0_10 = arith.constant 0 : index
    %10 = vector.load %arg6[%c0_9, %c0_10] : memref<1x32xf32, #tpu.memory_space<vmem>>, vector<1x32xf32>
    %11 = vector.broadcast %10 : vector<1x32xf32> to vector<8x32xf32>
    %12 = arith.addf %9, %11 : vector<8x32xf32>
    %cst_11 = arith.constant 0.000000e+00 : f32
    %13 = vector.broadcast %cst_11 : f32 to vector<8x32xf32>
    %14 = arith.maximumf %12, %13 : vector<8x32xf32>
    %c0_12 = arith.constant 0 : index
    %c0_13 = arith.constant 0 : index
    %15 = vector.load %arg7[%c0_12, %c0_13] : memref<32x32xf32, #tpu.memory_space<vmem>>, vector<32x32xf32>
    %cst_14 = arith.constant dense<0.000000e+00> : vector<8x32xf32>
    %16 = tpu.matmul %14, %15, %cst_14 {dimension_numbers = #tpu.dot_dimension_numbers<[1], [0], [0], [1], [0, 0, 1, 1], [], []>} : vector<8x32xf32>, vector<32x32xf32>, vector<8x32xf32> -> vector<8x32xf32>
    %c0_15 = arith.constant 0 : index
    %c0_16 = arith.constant 0 : index
    %17 = vector.load %arg8[%c0_15, %c0_16] : memref<1x32xf32, #tpu.memory_space<vmem>>, vector<1x32xf32>
    %18 = vector.broadcast %17 : vector<1x32xf32> to vector<8x32xf32>
    %19 = arith.addf %16, %18 : vector<8x32xf32>
    %cst_17 = arith.constant 0.000000e+00 : f32
    %20 = vector.broadcast %cst_17 : f32 to vector<8x32xf32>
    %21 = arith.maximumf %19, %20 : vector<8x32xf32>
    %c0_18 = arith.constant 0 : index
    %c0_19 = arith.constant 0 : index
    %22 = vector.load %arg9[%c0_18, %c0_19] : memref<32x128xf32, #tpu.memory_space<vmem>>, vector<32x128xf32>
    %cst_20 = arith.constant dense<0.000000e+00> : vector<8x128xf32>
    %23 = tpu.matmul %21, %22, %cst_20 {dimension_numbers = #tpu.dot_dimension_numbers<[1], [0], [0], [1], [0, 0, 1, 1], [], []>} : vector<8x32xf32>, vector<32x128xf32>, vector<8x128xf32> -> vector<8x128xf32>
    %c0_21 = arith.constant 0 : index
    %c0_22 = arith.constant 0 : index
    %24 = vector.load %arg10[%c0_21, %c0_22] : memref<1x128xf32, #tpu.memory_space<vmem>>, vector<1x128xf32>
    %25 = vector.broadcast %24 : vector<1x128xf32> to vector<8x128xf32>
    %26 = arith.addf %23, %25 : vector<8x128xf32>
    %c64_i32 = arith.constant 64 : i32
    %27 = tpu.dynamic_rotate %26 by %c64_i32 dim 1 : vector<8x128xf32>, i32 -> vector<8x128xf32>
    %cst_23 = arith.constant -5.000000e+00 : f32
    %cst_24 = arith.constant 2.000000e+00 : f32
    %28 = vector.broadcast %cst_23 : f32 to vector<8x128xf32>
    %29 = arith.maximumf %28, %27 : vector<8x128xf32>
    %30 = vector.broadcast %cst_24 : f32 to vector<8x128xf32>
    %31 = arith.minimumf %30, %29 : vector<8x128xf32>
    %c0_25 = arith.constant 0 : index
    %c0_26 = arith.constant 0 : index
    %32 = vector.load %arg2[%c0_25, %c0_26] : memref<8x128xf32, #tpu.memory_space<vmem>>, vector<8x128xf32>
    %33 = math.exp %31 : vector<8x128xf32>
    %34 = arith.mulf %33, %32 : vector<8x128xf32>
    %35 = arith.addf %26, %34 : vector<8x128xf32>
    %36 = math.tanh %35 : vector<8x128xf32>
    %cst_27 = arith.constant 1.000000e+00 : f32
    %37 = vector.broadcast %cst_27 : f32 to vector<8x128xf32>
    %38 = arith.mulf %36, %37 : vector<8x128xf32>
    %cst_28 = arith.constant 0.000000e+00 : f32
    %39 = vector.broadcast %cst_28 : f32 to vector<8x128xf32>
    %40 = arith.subf %39, %31 : vector<8x128xf32>
    %cst_29 = arith.constant 0.918938517 : f32
    %41 = vector.broadcast %cst_29 : f32 to vector<8x128xf32>
    %42 = arith.subf %40, %41 : vector<8x128xf32>
    %43 = arith.mulf %32, %32 : vector<8x128xf32>
    %cst_30 = arith.constant 5.000000e-01 : f32
    %44 = vector.broadcast %cst_30 : f32 to vector<8x128xf32>
    %45 = arith.mulf %44, %43 : vector<8x128xf32>
    %46 = arith.subf %42, %45 : vector<8x128xf32>
    %47 = arith.mulf %36, %36 : vector<8x128xf32>
    %cst_31 = arith.constant 1.000000e+00 : f32
    %48 = vector.broadcast %cst_31 : f32 to vector<8x128xf32>
    %49 = arith.subf %48, %47 : vector<8x128xf32>
    %cst_32 = arith.constant 9.99999997E-7 : f32
    %50 = vector.broadcast %cst_32 : f32 to vector<8x128xf32>
    %51 = arith.addf %49, %50 : vector<8x128xf32>
    %52 = math.log %51 : vector<8x128xf32>
    %53 = tpu.iota {dimensions = array<i32: 1>} : vector<8x128xi32>
    %c8_i32 = arith.constant 8 : i32
    %54 = vector.broadcast %c8_i32 : i32 to vector<8x128xi32>
    %55 = arith.cmpi slt, %53, %54 : vector<8x128xi32>
    %56 = arith.subf %46, %52 : vector<8x128xf32>
    %cst_33 = arith.constant 0.000000e+00 : f32
    %57 = vector.broadcast %cst_33 : f32 to vector<8x128xf32>
    %58 = arith.select %55, %56, %57 : vector<8x128xi1>, vector<8x128xf32>
    %cst_34 = arith.constant dense<0.000000e+00> : vector<8xf32>
    %59 = vector.multi_reduction <add>, %58, %cst_34 [1] : vector<8x128xf32> to vector<8xf32>
    %60 = vector.shape_cast %59 : vector<8xf32> to vector<8x1xf32>
    %c127_i32 = arith.constant 127 : i32
    %61 = vector.broadcast %c127_i32 : i32 to vector<8x128xi32>
    %62 = arith.cmpi eq, %53, %61 : vector<8x128xi32>
    %63 = vector.shape_cast %60 : vector<8x1xf32> to vector<8x1xf32>
    %64 = vector.broadcast %63 : vector<8x1xf32> to vector<8x128xf32>
    %65 = arith.select %62, %64, %38 : vector<8x128xi1>, vector<8x128xf32>
    %c0_35 = arith.constant 0 : index
    %c0_36 = arith.constant 0 : index
    %66 = vector.load %arg11[%c0_35, %c0_36] : memref<8x128xf32, #tpu.memory_space<vmem>>, vector<8x128xf32>
    tpu.vector_store %arg11[%c0_35, %c0_36], %65 {strides = array<i32>} : memref<8x128xf32, #tpu.memory_space<vmem>>, vector<8x128xf32>,
    return
  }
  func.func @transform_0(%arg0: i32) -> (i32, i32) {
    %c0_i32 = arith.constant 0 : i32
    %c0_i32_0 = arith.constant 0 : i32
    return %arg0, %c0_i32 : i32, i32
  }
  func.func @transform_1(%arg0: i32) -> (i32, i32) {
    %c0_i32 = arith.constant 0 : i32
    %c0_i32_0 = arith.constant 0 : i32
    return %arg0, %c0_i32 : i32, i32
  }
  func.func @transform_2(%arg0: i32) -> (i32, i32) {
    %c0_i32 = arith.constant 0 : i32
    %c0_i32_0 = arith.constant 0 : i32
    %c0_i32_1 = arith.constant 0 : i32
    return %c0_i32, %c0_i32_0 : i32, i32
  }
  func.func @transform_3(%arg0: i32) -> (i32, i32) {
    %c0_i32 = arith.constant 0 : i32
    %c0_i32_0 = arith.constant 0 : i32
    %c0_i32_1 = arith.constant 0 : i32
    return %c0_i32, %c0_i32_0 : i32, i32
  }
  func.func @transform_4(%arg0: i32) -> (i32, i32) {
    %c0_i32 = arith.constant 0 : i32
    %c0_i32_0 = arith.constant 0 : i32
    %c0_i32_1 = arith.constant 0 : i32
    return %c0_i32, %c0_i32_0 : i32, i32
  }
  func.func @transform_5(%arg0: i32) -> (i32, i32) {
    %c0_i32 = arith.constant 0 : i32
    %c0_i32_0 = arith.constant 0 : i32
    %c0_i32_1 = arith.constant 0 : i32
    return %c0_i32, %c0_i32_0 : i32, i32
  }
  func.func @transform_6(%arg0: i32) -> (i32, i32) {
    %c0_i32 = arith.constant 0 : i32
    %c0_i32_0 = arith.constant 0 : i32
    %c0_i32_1 = arith.constant 0 : i32
    return %c0_i32, %c0_i32_0 : i32, i32
  }
  func.func @transform_7(%arg0: i32) -> (i32, i32) {
    %c0_i32 = arith.constant 0 : i32
    %c0_i32_0 = arith.constant 0 : i32
    %c0_i32_1 = arith.constant 0 : i32
    return %c0_i32, %c0_i32_0 : i32, i32
  }
  func.func @transform_8(%arg0: i32) -> (i32, i32) {
    %c0_i32 = arith.constant 0 : i32
    %c0_i32_0 = arith.constant 0 : i32
    %c0_i32_1 = arith.constant 0 : i32
    return %c0_i32, %c0_i32_0 : i32, i32
  }
  func.func @transform_9(%arg0: i32) -> (i32, i32) {
    %c0_i32 = arith.constant 0 : i32
    %c0_i32_0 = arith.constant 0 : i32
    %c0_i32_1 = arith.constant 0 : i32
    return %c0_i32, %c0_i32_0 : i32, i32
  }
  func.func @transform_10(%arg0: i32) -> (i32, i32) {
    %c0_i32 = arith.constant 0 : i32
    %c0_i32_0 = arith.constant 0 : i32
    return %arg0, %c0_i32 : i32, i32
  }
}

module attributes {stable_mosaic.version = 11 : i64} {
  func.func @kernel(%arg0: i32, %arg1: memref<8x16xf32, #tpu.memory_space<vmem>>, %arg2: memref<8x128xf32, #tpu.memory_space<vmem>>, %arg3: memref<16x32xf32, #tpu.memory_space<vmem>>, %arg4: memref<1x32xf32, #tpu.memory_space<vmem>>, %arg5: memref<32x32xf32, #tpu.memory_space<vmem>>, %arg6: memref<1x32xf32, #tpu.memory_space<vmem>>, %arg7: memref<32x32xf32, #tpu.memory_space<vmem>>, %arg8: memref<1x32xf32, #tpu.memory_space<vmem>>, %arg9: memref<32x128xf32, #tpu.memory_space<vmem>>, %arg10: memref<1x128xf32, #tpu.memory_space<vmem>>, %arg11: memref<8x128xf32, #tpu.memory_space<vmem>>) attributes {dimension_semantics = [#tpu.dimension_semantics<parallel>], iteration_bounds = array<i64: 1>, scalar_prefetch = 0 : i64, scratch_operands = 0 : i64, tpu.core_type = #tpu.core_type<tc>, window_params = [{transform_indices = @transform_0, window_bounds = array<i64: 8, 16>}, {transform_indices = @transform_1, window_bounds = array<i64: 8, 128>}, {pipeline_mode = #tpu.pipeline_mode<synchronous>, transform_indices = @transform_2, window_bounds = array<i64: 16, 32>}, {pipeline_mode = #tpu.pipeline_mode<synchronous>, transform_indices = @transform_3, window_bounds = array<i64: 1, 32>}, {pipeline_mode = #tpu.pipeline_mode<synchronous>, transform_indices = @transform_4, window_bounds = array<i64: 32, 32>}, {pipeline_mode = #tpu.pipeline_mode<synchronous>, transform_indices = @transform_5, window_bounds = array<i64: 1, 32>}, {pipeline_mode = #tpu.pipeline_mode<synchronous>, transform_indices = @transform_6, window_bounds = array<i64: 32, 32>}, {pipeline_mode = #tpu.pipeline_mode<synchronous>, transform_indices = @transform_7, window_bounds = array<i64: 1, 32>}, {pipeline_mode = #tpu.pipeline_mode<synchronous>, transform_indices = @transform_8, window_bounds = array<i64: 32, 128>}, {pipeline_mode = #tpu.pipeline_mode<synchronous>, transform_indices = @transform_9, window_bounds = array<i64: 1, 128>}, {transform_indices = @transform_10, window_bounds = array<i64: 8, 128>}]} {
    %c0 = arith.constant 0 : index
    %c0_0 = arith.constant 0 : index
    %0 = vector.load %arg1[%c0, %c0_0] : memref<8x16xf32, #tpu.memory_space<vmem>>, vector<8x16xf32>
    %c0_1 = arith.constant 0 : index
    %c0_2 = arith.constant 0 : index
    %1 = vector.load %arg3[%c0_1, %c0_2] : memref<16x32xf32, #tpu.memory_space<vmem>>, vector<16x32xf32>
    %cst = arith.constant dense<0.000000e+00> : vector<8x32xf32>
    %2 = tpu.matmul %0, %1, %cst {dimension_numbers = #tpu.dot_dimension_numbers<[1], [0], [0], [1], [0, 0, 1, 1], [], []>} : vector<8x16xf32>, vector<16x32xf32>, vector<8x32xf32> -> vector<8x32xf32>
    %c0_3 = arith.constant 0 : index
    %c0_4 = arith.constant 0 : index
    %3 = vector.load %arg4[%c0_3, %c0_4] : memref<1x32xf32, #tpu.memory_space<vmem>>, vector<1x32xf32>
    %4 = vector.broadcast %3 : vector<1x32xf32> to vector<8x32xf32>
    %5 = arith.addf %2, %4 : vector<8x32xf32>
    %cst_5 = arith.constant 0.000000e+00 : f32
    %6 = vector.broadcast %cst_5 : f32 to vector<8x32xf32>
    %7 = arith.maximumf %5, %6 : vector<8x32xf32>
    %c0_6 = arith.constant 0 : index
    %c0_7 = arith.constant 0 : index
    %8 = vector.load %arg5[%c0_6, %c0_7] : memref<32x32xf32, #tpu.memory_space<vmem>>, vector<32x32xf32>
    %cst_8 = arith.constant dense<0.000000e+00> : vector<8x32xf32>
    %9 = tpu.matmul %7, %8, %cst_8 {dimension_numbers = #tpu.dot_dimension_numbers<[1], [0], [0], [1], [0, 0, 1, 1], [], []>} : vector<8x32xf32>, vector<32x32xf32>, vector<8x32xf32> -> vector<8x32xf32>
    %c0_9 = arith.constant 0 : index
    %c0_10 = arith.constant 0 : index
    %10 = vector.load %arg6[%c0_9, %c0_10] : memref<1x32xf32, #tpu.memory_space<vmem>>, vector<1x32xf32>
    %11 = vector.broadcast %10 : vector<1x32xf32> to vector<8x32xf32>
    %12 = arith.addf %9, %11 : vector<8x32xf32>
    %cst_11 = arith.constant 0.000000e+00 : f32
    %13 = vector.broadcast %cst_11 : f32 to vector<8x32xf32>
    %14 = arith.maximumf %12, %13 : vector<8x32xf32>
    %c0_12 = arith.constant 0 : index
    %c0_13 = arith.constant 0 : index
    %15 = vector.load %arg7[%c0_12, %c0_13] : memref<32x32xf32, #tpu.memory_space<vmem>>, vector<32x32xf32>
    %cst_14 = arith.constant dense<0.000000e+00> : vector<8x32xf32>
    %16 = tpu.matmul %14, %15, %cst_14 {dimension_numbers = #tpu.dot_dimension_numbers<[1], [0], [0], [1], [0, 0, 1, 1], [], []>} : vector<8x32xf32>, vector<32x32xf32>, vector<8x32xf32> -> vector<8x32xf32>
    %c0_15 = arith.constant 0 : index
    %c0_16 = arith.constant 0 : index
    %17 = vector.load %arg8[%c0_15, %c0_16] : memref<1x32xf32, #tpu.memory_space<vmem>>, vector<1x32xf32>
    %18 = vector.broadcast %17 : vector<1x32xf32> to vector<8x32xf32>
    %19 = arith.addf %16, %18 : vector<8x32xf32>
    %cst_17 = arith.constant 0.000000e+00 : f32
    %20 = vector.broadcast %cst_17 : f32 to vector<8x32xf32>
    %21 = arith.maximumf %19, %20 : vector<8x32xf32>
    %c0_18 = arith.constant 0 : index
    %c0_19 = arith.constant 0 : index
    %22 = vector.load %arg9[%c0_18, %c0_19] : memref<32x128xf32, #tpu.memory_space<vmem>>, vector<32x128xf32>
    %cst_20 = arith.constant dense<0.000000e+00> : vector<8x128xf32>
    %23 = tpu.matmul %21, %22, %cst_20 {dimension_numbers = #tpu.dot_dimension_numbers<[1], [0], [0], [1], [0, 0, 1, 1], [], []>} : vector<8x32xf32>, vector<32x128xf32>, vector<8x128xf32> -> vector<8x128xf32>
    %c0_21 = arith.constant 0 : index
    %c0_22 = arith.constant 0 : index
    %24 = vector.load %arg10[%c0_21, %c0_22] : memref<1x128xf32, #tpu.memory_space<vmem>>, vector<1x128xf32>
    %25 = vector.broadcast %24 : vector<1x128xf32> to vector<8x128xf32>
    %26 = arith.addf %23, %25 : vector<8x128xf32>
    %c64_i32 = arith.constant 64 : i32
    %27 = tpu.dynamic_rotate %26 by %c64_i32 dim 1 : vector<8x128xf32>, i32 -> vector<8x128xf32>
    %cst_23 = arith.constant -5.000000e+00 : f32
    %cst_24 = arith.constant 2.000000e+00 : f32
    %28 = vector.broadcast %cst_23 : f32 to vector<8x128xf32>
    %29 = arith.maximumf %28, %27 : vector<8x128xf32>
    %30 = vector.broadcast %cst_24 : f32 to vector<8x128xf32>
    %31 = arith.minimumf %30, %29 : vector<8x128xf32>
    %c0_25 = arith.constant 0 : index
    %c0_26 = arith.constant 0 : index
    %32 = vector.load %arg2[%c0_25, %c0_26] : memref<8x128xf32, #tpu.memory_space<vmem>>, vector<8x128xf32>
    %33 = math.exp %31 : vector<8x128xf32>
    %34 = arith.mulf %33, %32 : vector<8x128xf32>
    %35 = arith.addf %26, %34 : vector<8x128xf32>
    %36 = math.tanh %35 : vector<8x128xf32>
    %cst_27 = arith.constant 1.000000e+00 : f32
    %37 = vector.broadcast %cst_27 : f32 to vector<8x128xf32>
    %38 = arith.mulf %36, %37 : vector<8x128xf32>
    %cst_28 = arith.constant 0.000000e+00 : f32
    %39 = vector.broadcast %cst_28 : f32 to vector<8x128xf32>
    %40 = arith.subf %39, %31 : vector<8x128xf32>
    %cst_29 = arith.constant 0.918938517 : f32
    %41 = vector.broadcast %cst_29 : f32 to vector<8x128xf32>
    %42 = arith.subf %40, %41 : vector<8x128xf32>
    %43 = arith.mulf %32, %32 : vector<8x128xf32>
    %cst_30 = arith.constant 5.000000e-01 : f32
    %44 = vector.broadcast %cst_30 : f32 to vector<8x128xf32>
    %45 = arith.mulf %44, %43 : vector<8x128xf32>
    %46 = arith.subf %42, %45 : vector<8x128xf32>
    %47 = arith.mulf %36, %36 : vector<8x128xf32>
    %cst_31 = arith.constant 1.000000e+00 : f32
    %48 = vector.broadcast %cst_31 : f32 to vector<8x128xf32>
    %49 = arith.subf %48, %47 : vector<8x128xf32>
    %cst_32 = arith.constant 9.99999997E-7 : f32
    %50 = vector.broadcast %cst_32 : f32 to vector<8x128xf32>
    %51 = arith.addf %49, %50 : vector<8x128xf32>
    %52 = math.log %51 : vector<8x128xf32>
    %53 = tpu.iota {dimensions = array<i32: 1>} : vector<8x128xi32>
    %c8_i32 = arith.constant 8 : i32
    %54 = vector.broadcast %c8_i32 : i32 to vector<8x128xi32>
    %55 = arith.cmpi slt, %53, %54 : vector<8x128xi32>
    %56 = arith.subf %46, %52 : vector<8x128xf32>
    %cst_33 = arith.constant 0.000000e+00 : f32
    %57 = vector.broadcast %cst_33 : f32 to vector<8x128xf32>
    %58 = arith.select %55, %56, %57 : vector<8x128xi1>, vector<8x128xf32>
    %cst_34 = arith.constant dense<0.000000e+00> : vector<8xf32>
    %59 = vector.multi_reduction <add>, %58, %cst_34 [1] : vector<8x128xf32> to vector<8xf32>
    %60 = vector.shape_cast %59 : vector<8xf32> to vector<8x1xf32>
    %c127_i32 = arith.constant 127 : i32
    %61 = vector.broadcast %c127_i32 : i32 to vector<8x128xi32>
    %62 = arith.cmpi eq, %53, %61 : vector<8x128xi32>
    %63 = vector.shape_cast %60 : vector<8x1xf32> to vector<8x1xf32>
    %64 = vector.broadcast %63 : vector<8x1xf32> to vector<8x128xf32>
    %65 = arith.select %62, %64, %38 : vector<8x128xi1>, vector<8x128xf32>
    %c0_35 = arith.constant 0 : index
    %c0_36 = arith.constant 0 : index
    %66 = vector.load %arg11[%c0_35, %c0_36] : memref<8x128xf32, #tpu.memory_space<vmem>>, vector<8x128xf32>
    tpu.vector_store %arg11[%c0_35, %c0_36], %65 {strides = array<i32>} : memref<8x128xf32, #tpu.memory_space<vmem>>, vector<8x128xf32>,
    return
  }
  func.func @transform_0(%arg0: i32) -> (i32, i32) {
    %c0_i32 = arith.constant 0 : i32
    %c0_i32_0 = arith.constant 0 : i32
    return %arg0, %c0_i32 : i32, i32
  }
  func.func @transform_1(%arg0: i32) -> (i32, i32) {
    %c0_i32 = arith.constant 0 : i32
    %c0_i32_0 = arith.constant 0 : i32
    return %arg0, %c0_i32 : i32, i32
  }
  func.func @transform_2(%arg0: i32) -> (i32, i32) {
    %c0_i32 = arith.constant 0 : i32
    %c0_i32_0 = arith.constant 0 : i32
    %c0_i32_1 = arith.constant 0 : i32
    return %c0_i32, %c0_i32_0 : i32, i32
  }
  func.func @transform_3(%arg0: i32) -> (i32, i32) {
    %c0_i32 = arith.constant 0 : i32
    %c0_i32_0 = arith.constant 0 : i32
    %c0_i32_1 = arith.constant 0 : i32
    return %c0_i32, %c0_i32_0 : i32, i32
  }
  func.func @transform_4(%arg0: i32) -> (i32, i32) {
    %c0_i32 = arith.constant 0 : i32
    %c0_i32_0 = arith.constant 0 : i32
    %c0_i32_1 = arith.constant 0 : i32
    return %c0_i32, %c0_i32_0 : i32, i32
  }
  func.func @transform_5(%arg0: i32) -> (i32, i32) {
    %c0_i32 = arith.constant 0 : i32
    %c0_i32_0 = arith.constant 0 : i32
    %c0_i32_1 = arith.constant 0 : i32
    return %c0_i32, %c0_i32_0 : i32, i32
  }
  func.func @transform_6(%arg0: i32) -> (i32, i32) {
    %c0_i32 = arith.constant 0 : i32
    %c0_i32_0 = arith.constant 0 : i32
    %c0_i32_1 = arith.constant 0 : i32
    return %c0_i32, %c0_i32_0 : i32, i32
  }
  func.func @transform_7(%arg0: i32) -> (i32, i32) {
    %c0_i32 = arith.constant 0 : i32
    %c0_i32_0 = arith.constant 0 : i32
    %c0_i32_1 = arith.constant 0 : i32
    return %c0_i32, %c0_i32_0 : i32, i32
  }
  func.func @transform_8(%arg0: i32) -> (i32, i32) {
    %c0_i32 = arith.constant 0 : i32
    %c0_i32_0 = arith.constant 0 : i32
    %c0_i32_1 = arith.constant 0 : i32
    return %c0_i32, %c0_i32_0 : i32, i32
  }
  func.func @transform_9(%arg0: i32) -> (i32, i32) {
    %c0_i32 = arith.constant 0 : i32
    %c0_i32_0 = arith.constant 0 : i32
    %c0_i32_1 = arith.constant 0 : i32
    return %c0_i32, %c0_i32_0 : i32, i32
  }
  func.func @transform_10(%arg0: i32) -> (i32, i32) {
    %c0_i32 = arith.constant 0 : i32
    %c0_i32_0 = arith.constant 0 : i32
    return %arg0, %c0_i32 : i32, i32
  }
}

</mosaic_0001>

<bundles_post_ra>
// kernel: tpu_custom_call.1
= control target key start
LH: loop header
LB: loop body
LE: loop exit
PB: predicated region body
PF: predicated region fallthrough
CT: control target
= control target key end

     0   :  { %15 = vsyncpa [#allocation3], 0  ;;  %s856_s0 = inlined_call_operand.hbm [shape: f32[8,16], index: 0, kind: input, shape index: {}]   ;;  %s857_s1 = inlined_call_operand.hbm [shape: f32[8,128], index: 1, kind: input, shape index: {}]   ;;  %s858_s2 = inlined_call_operand.hbm [shape: f32[16,32], index: 2, kind: input, shape index: {}]   ;;  %s859_s3 = inlined_call_operand.vmem [shape: f32[1,32], index: 3, kind: input, shape index: {}]   ;;  %s860_s4 = inlined_call_operand.hbm [shape: f32[32,32], index: 4, kind: input, shape index: {}]   ;;  %s861_s5 = inlined_call_operand.vmem [shape: f32[1,32], index: 5, kind: input, shape index: {}]   ;;  %s862_s6 = inlined_call_operand.hbm [shape: f32[32,32], index: 6, kind: input, shape index: {}]   ;;  %s863_s7 = inlined_call_operand.vmem [shape: f32[1,32], index: 7, kind: input, shape index: {}]   ;;  %s864_s8 = inlined_call_operand.hbm [shape: f32[32,128], index: 8, kind: input, shape index: {}]   ;;  %s865_s9 = inlined_call_operand.vmem [shape: f32[1,128], index: 9, kind: input, shape index: {}]   ;;  %s866_s10 = inlined_call_operand.hbm [shape: f32[8,128], index: 10, kind: output, shape index: {}]  }
   0x1   :  { %16 = vsyncpa [#allocation6], 0 }
   0x2   :  { %17 = vsyncpa [#allocation9], 0 }
   0x3   :  { %18 = vsyncpa [#allocation12], 0 }
   0x4   :  { %19 = vsyncpa [#allocation4], 0  ;;  %s737_s13 = smov [#allocation5]  }
   0x5   :  { %s36_s14 = sshll.u32 %s737_s13, 4  ;;  %s37_s14 = int_to_ptr.vmem [resolvable:$true] %s36_s14 }
   0x6   :  { %s595_s15 = scalar_lea.vmem %s37_s14, 128  ;;  %p600_p1 = scmp.lt.s32.totalorder %s37_s14, %s37_s14 }
   0x7   :  { %p596_p0 = scmp.ne.s32.totalorder %s37_s14, %s595_s15  ;;  %p601_p2 = scmp.lt.s32.totalorder %s595_s15, %s595_s15 }
   0x9   :  { %p602_p3 = por %p601_p2, %p600_p1 }
   0xb   :  { %p603_p4 = pnand %p602_p3, %p596_p0 }
   0xd   :  { %606 = shalt.err (!%p603_p4)
}
   0xe   :  { %39 = dma.hbm_to_vmem [thread:$0]  %s857_s1, 128, %s37_s14, [#allocation6]  }
   0xf   :  { %s738_s18 = smov [#allocation8]   ;;  %s739_s20 = smov [#allocation2]  }
  0x10   :  { %s59_s19 = sshll.u32 %s738_s18, 4  ;;  %s26_s21 = sshll.u32 %s739_s20, 4  ;;  %s60_s19 = int_to_ptr.vmem [resolvable:$true] %s59_s19  ;;  %s27_s21 = int_to_ptr.vmem [resolvable:$true] %s26_s21 }
  0x11   :  { %s615_s22 = scalar_lea.vmem %s60_s19, 512  ;;  %p620_p6 = scmp.lt.s32.totalorder %s60_s19, %s60_s19 }
  0x12   :  { %p616_p5 = scmp.ne.s32.totalorder %s60_s19, %s615_s22  ;;  %p621_p7 = scmp.lt.s32.totalorder %s615_s22, %s615_s22 }
  0x14   :  { %p622_p8 = por %p621_p7, %p620_p6 }
  0x16   :  { %p623_p9 = pnand %p622_p8, %p616_p5 }
  0x18   :  { %626 = shalt.err (!%p623_p9)
}
  0x19   :  { %s740_s23 = smov 128   ;;  %s741_s24 = smov 8  }
  0x1a   :  { %65 = dma.hbm_to_vmem [thread:$0]  %s860_s4, 512, %s60_s19, [#allocation9], %s740_s23, %s740_s23, %s741_s24  }
  0x1b   :  { %s635_s1 = scalar_lea.vmem %s27_s21, 128  ;;  %p640_p11 = scmp.lt.s32.totalorder %s27_s21, %s27_s21 }
  0x1c   :  { %p636_p10 = scmp.ne.s32.totalorder %s27_s21, %s635_s1  ;;  %p641_p12 = scmp.lt.s32.totalorder %s635_s1, %s635_s1 }
  0x1e   :  { %p642_p13 = por %p641_p12, %p640_p11 }
  0x20   :  { %p643_p0 = pnand %p642_p13, %p636_p10 }
  0x22   :  { %646 = shalt.err (!%p643_p0)
}
  0x23   :  { %29 = dma.hbm_to_vmem [thread:$0]  %s856_s0, 128, %s27_s21, [#allocation3]  }
  0x24   :  { %s742_s29 = smov [#allocation7]   ;;  %s743_s11 = smov [#allocation10]  }
  0x25   :  { %s45_s30 = sshll.u32 %s742_s29, 4  ;;  %s73_s12 = sshll.u32 %s743_s11, 4  ;;  %s46_s30 = int_to_ptr.vmem [resolvable:$true] %s45_s30  ;;  %s74_s12 = int_to_ptr.vmem [resolvable:$true] %s73_s12 }
  0x26   :  { %s655_s13 = scalar_lea.vmem %s46_s30, 256  ;;  %p660_p2 = scmp.lt.s32.totalorder %s46_s30, %s46_s30 }
  0x27   :  { %p656_p1 = scmp.ne.s32.totalorder %s46_s30, %s655_s13  ;;  %p661_p3 = scmp.lt.s32.totalorder %s655_s13, %s655_s13 }
  0x29   :  { %p662_p4 = por %p661_p3, %p660_p2 }
  0x2b   :  { %p663_p5 = pnand %p662_p4, %p656_p1 }
  0x2d   :  { %666 = shalt.err (!%p663_p5)
}
  0x2e   :  { %51 = dma.hbm_to_vmem [thread:$0]  %s858_s2, 256, %s46_s30, [#allocation6], %s740_s23, %s740_s23, %s741_s24  }
  0x2f   :  { %s675_s0 = scalar_lea.vmem %s74_s12, 512  ;;  %p680_p7 = scmp.lt.s32.totalorder %s74_s12, %s74_s12 }
  0x30   :  { %p676_p6 = scmp.ne.s32.totalorder %s74_s12, %s675_s0  ;;  %p681_p8 = scmp.lt.s32.totalorder %s675_s0, %s675_s0 }
  0x32   :  { %p682_p9 = por %p681_p8, %p680_p7 }
  0x34   :  { %p683_p10 = pnand %p682_p9, %p676_p6 }
  0x36   :  { %686 = shalt.err (!%p683_p10)
}
  0x37   :  { %79 = dma.hbm_to_vmem [thread:$0]  %s862_s6, 512, %s74_s12, [#allocation9], %s740_s23, %s740_s23, %s741_s24  }
  0x38   :  { %s744_s17 = smov [#allocation11]  }
  0x39   :  { %s87_s18 = sshll.u32 %s744_s17, 4  ;;  %s88_s18 = int_to_ptr.vmem [resolvable:$true] %s87_s18 }
  0x3a   :  { %s695_s19 = scalar_lea.vmem %s88_s18, 512  ;;  %p700_p12 = scmp.lt.s32.totalorder %s88_s18, %s88_s18 }
  0x3b   :  { %p696_p11 = scmp.ne.s32.totalorder %s88_s18, %s695_s19  ;;  %p701_p13 = scmp.lt.s32.totalorder %s695_s19, %s695_s19 }
  0x3d   :  { %p702_p0 = por %p701_p13, %p700_p12 }
  0x3f   :  { %p703_p1 = pnand %p702_p0, %p696_p11 }
  0x41   :  { %706 = shalt.err (!%p703_p1)
}
  0x42   :  { %93 = dma.hbm_to_vmem [thread:$0]  %s864_s8, 512, %s88_s18, [#allocation12], %s740_s23, %s740_s23, %s741_s24  }
  0x43   :  { %727 = dma.done.wait [#allocation3], 128  }
  0x44   :  { %728 = vsyncadd [#allocation3], 4294967168 }
  0x45   :  { %729 = dma.done.wait [#allocation6], 384  }
  0x46   :  { %730 = vsyncadd [#allocation6], 4294966912 }
  0x47   :  { %731 = dma.done.wait [#allocation9], 1024  }
  0x48   :  { %732 = vsyncadd [#allocation9], 4294966272 }
  0x49   :  { %733 = dma.done.wait [#allocation12], 512  }
  0x4a   :  { %734 = vsyncadd [#allocation12], 4294966784  ;;  %v745_v0 = vmov 0.0   ;;  %vm746_vm0 = vmmov 0   ;;  %v116_v1 = vld [vmem:[#allocation7 + $0x8] sm:$0xff]  ;;  %v115_v2 = vld [vmem:[#allocation7] sm:$0xff]  ;;  %v474_v49 = vlaneseq }
  0x4b   :  { %529 = vmatprep.subr.mxu0 %v745_v0  ;;  %533 = vmatprep.mubr.msk.f32.mxu0 %vm746_vm0, %v745_v0  ;;  %v114_v3 = vld [vmem:[#allocation2] sm:$0xff]  ;;  %vm124_vm1 = vcmask 130048   ;;  %v202_v4 = vld [vmem:[#allocation8 + $0x18] sm:$0xff]  ;;  %v201_v5 = vld [vmem:[#allocation8 + $0x10] sm:$0xff]  ;;  %vm210_vm2 = vcmask 261120   ;;  %s747_s25 = smov 64  }
  0x4c   :  { %536 = vmatprep.subr.mxu1 %v745_v0  ;;  %544 = vmatprep.mubr.msk.f32.mxu1 %vm746_vm0, %v745_v0  ;;  %v200_v6 = vld [vmem:[#allocation8 + $0x8] sm:$0xff]  ;;  %v199_v7 = vld [vmem:[#allocation8] sm:$0xff]  ;;  %v288_v8 = vld [vmem:[#allocation10 + $0x18] sm:$0xff]  ;;  %v475_v52 = vand.u32 127, %v474_v49 }
  0x4d   :  { %530 = vmatpush3.msra.mxu0 %v116_v1  ;;  %537 = vmatpush3.msra.mxu1 %v202_v4  ;;  %v502_v9 = vld [vmem:[%s859_s3] ss:$0 sm:$0xff]  ;;  %v287_v14 = vld [vmem:[#allocation10 + $0x10] sm:$0xff]  ;;  %v286_v15 = vld [vmem:[#allocation10 + $0x8] sm:$0xff] }
  0x4e   :  { %531 = vmatprep.subr.mxu0 %v745_v0  ;;  %538 = vmatprep.subr.mxu1 %v745_v0  ;;  %v285_v16 = vld [vmem:[#allocation10] sm:$0xff]  ;;  %v373_v17 = vld [vmem:[#allocation11 + $0x18] sm:$0xff]  ;;  %v372_v23 = vld [vmem:[#allocation11 + $0x10] sm:$0xff]  ;;  %vm476_vm3 = vcmp.lt.s32.totalorder %v475_v52, 8  ;;  %vm481_vm4 = vcmp.eq.s32.totalorder %v475_v52, 127 }
  0x4f   :  { %532 = vmatpush3.msra.mxu0 %v115_v2  ;;  %539 = vmatpush3.msra.mxu1 %v201_v5  ;;  %v504_v18 = vld [vmem:[%s861_s5] ss:$0 sm:$0xff]  ;;  %v371_v24 = vld [vmem:[#allocation11 + $0x8] sm:$0xff] }
  0x50   :  { %534 = vmatmul.mubr.msk.f32.vlgmr.msra.gmra.mxu0 %vm124_vm1, %v114_v3  ;;  %547 = vmatprep.subr.mxu0 %v745_v0  ;;  %v370_v25 = vld [vmem:[#allocation11] sm:$0xff]  ;;  %v458_v40 = vld [vmem:[#allocation5] sm:$0xff] }
  0x51   :  { %555 = vmatprep.mubr.msk.f32.mxu0 %vm746_vm0, %v745_v0  ;;  %540 = vmatprep.subr.mxu1 %v745_v0  ;;  %v506_v26 = vld [vmem:[%s863_s7] ss:$0 sm:$0xff]  ;;  %v466_v48 = vmul.f32 %v458_v40, %v458_v40  ;;  %s748_s7 = smov [#allocation13]  }
  0x52   :  { %541 = vmatpush3.msra.mxu1 %v200_v6  ;;  %548 = vmatpush3.msra.mxu0 %v288_v8  ;;  %v508_v31 = vld [vmem:[%s865_s9] ss:$0 sm:$0xff]  ;;  %s490_s9 = sshll.u32 %s748_s7, 4  ;;  %s491_s9 = int_to_ptr.vmem [resolvable:$true] %s490_s9 }
  0x53   :  { %542 = vmatprep.subr.mxu1 %v745_v0  ;;  %549 = vmatprep.subr.mxu0 %v745_v0  ;;  %v467_v51 = vmul.f32 0.5, %v466_v48  ;;  %s707_s26 = scalar_lea.vmem %s491_s9, 128  ;;  %p712_p3 = scmp.lt.s32.totalorder %s491_s9, %s491_s9 }
  0x54   :  { %543 = vmatpush3.msra.mxu1 %v199_v7  ;;  %550 = vmatpush3.msra.mxu0 %v287_v14  ;;  %p708_p2 = scmp.ne.s32.totalorder %s491_s9, %s707_s26  ;;  %p713_p4 = scmp.lt.s32.totalorder %s707_s26, %s707_s26 }
  0x55   :  { %558 = vmatprep.subr.mxu1 %v745_v0  ;;  %551 = vmatprep.subr.mxu0 %v745_v0 }
  0x56   :  { %552 = vmatpush3.msra.mxu0 %v286_v15  ;;  %p714_p5 = por %p713_p4, %p712_p3 }
  0x57   :  { %553 = vmatprep.subr.mxu0 %v745_v0 }
  0x58   :  { %554 = vmatpush3.msra.mxu0 %v285_v16  ;;  %p715_p6 = pnand %p714_p5, %p708_p2 }
 0x110   :  { %v194_v10 = vpop.f32.mrf.mxu0 }
 0x111   :  { %v195_v11 = vadd.f32 %v502_v9, %v194_v10 }
 0x112   :  { %v535_v12 = vpop.f32.mrf.mxu0 }
 0x113   :  { %v198_v13 = vmax.f32 %v195_v11, 0.0 }
 0x115   :  { %545 = vmatmul.mubr.msk.f32.vlgmr.msra.gmra.mxu1 %vm210_vm2, %v198_v13 }
 0x116   :  { %566 = vmatprep.mubr.msk.f32.mxu1 %vm746_vm0, %v745_v0  ;;  %559 = vmatpush3.msra.mxu1 %v373_v17 }
 0x117   :  { %560 = vmatprep.subr.mxu1 %v745_v0 }
 0x118   :  { %561 = vmatpush3.msra.mxu1 %v372_v23 }
 0x119   :  { %562 = vmatprep.subr.mxu1 %v745_v0 }
 0x11a   :  { %563 = vmatpush3.msra.mxu1 %v371_v24 }
 0x11b   :  { %564 = vmatprep.subr.mxu1 %v745_v0 }
 0x11c   :  { %565 = vmatpush3.msra.mxu1 %v370_v25 }
 0x1d5   :  { %v280_v19 = vpop.f32.mrf.mxu1 }
 0x1d6   :  { %v281_v20 = vadd.f32 %v504_v18, %v280_v19 }
 0x1d7   :  { %v546_v21 = vpop.f32.mrf.mxu1 }
 0x1d8   :  { %v284_v22 = vmax.f32 %v281_v20, 0.0 }
 0x1da   :  { %556 = vmatmul.mubr.msk.f32.vlgmr.msra.gmra.mxu0 %vm210_vm2, %v284_v22 }
 0x29a   :  { %v365_v27 = vpop.f32.mrf.mxu0 }
 0x29b   :  { %v366_v28 = vadd.f32 %v506_v26, %v365_v27 }
 0x29c   :  { %v557_v29 = vpop.f32.mrf.mxu0 }
 0x29d   :  { %v369_v30 = vmax.f32 %v366_v28, 0.0 }
 0x29f   :  { %567 = vmatmul.mubr.msk.f32.vlgmr.msra.gmra.mxu1 %vm210_vm2, %v369_v30 }
 0x35f   :  { %v450_v32 = vpop.f32.mrf.mxu1 }
 0x360   :  { %v451_v33 = vadd.f32 %v508_v31, %v450_v32 }
 0x361   :  { %v568_v34 = vpop.f32.mrf.mxu1 }
 0x362   :  { %454 = vrot.lane.b32.xlu0 %v451_v33, %s747_s25 }
 0x3d4   :  { %v455_v35 = vpop.permute.xlu0 %454 }
 0x3d5   :  { %v456_v36 = vmax.f32 %v455_v35, -5.0 }
 0x3d7   :  { %v457_v37 = vmin.f32 %v456_v36, 2.0 }
 0x3d9   :  { %v459_v38 = vmul.f32 1.442695, %v457_v37  ;;  %v464_v47 = vsub.f32 0.0, %v457_v37 }
 0x3db   :  { %581 = vpow2.f32 %v459_v38  ;;  %v510_v50 = vadd.f32 -0.9189385, %v464_v47 }
 0x3dd   :  { %v468_v54 = vsub.f32 %v510_v50, %v467_v51 }
 0x3e8   :  { %v582_v39 = vpop.eup %581 }
 0x3e9   :  { %v461_v41 = vmul.f32 %v582_v39, %v458_v40 }
 0x3eb   :  { %v462_v42 = vadd.f32 %v461_v41, %v451_v33 }
 0x3ed   :  { %583 = vtanh.f32 %v462_v42 }
 0x3fa   :  { %v584_v43 = vpop.eup %583 }
 0x3fb   :  { %v469_v44 = vmul.f32 %v584_v43, %v584_v43 }
 0x3fd   :  { %v470_v45 = vsub.f32 1.0, %v469_v44 }
 0x3ff   :  { %v471_v46 = vadd.f32 1e-06, %v470_v45 }
 0x401   :  { %585 = vlog2.f32 %v471_v46 }
 0x40e   :  { %v586_v53 = vpop.eup %585 }
 0x40f   :  { %v473_v55 = vmul.f32 0.6931472, %v586_v53 }
 0x411   :  { %v477_v56 = vsub.f32 %v468_v54, %v473_v55 }
 0x413   :  { %v478_v57 = vsel %vm476_vm3, %v477_v56, 0.0 }
 0x414   :  { %479 = vadd.xlane.f32.xlu0 %v478_v57 }
 0x49d   :  { %v480_v58 = vpop.xlane.xlu0 %479 }
 0x49e   :  { %v482_v59 = vsel %vm481_vm4, %v480_v58, %v584_v43 }
 0x49f   :  { %483 = vst [vmem:[#allocation13] sm:$0xff] %v482_v59 }
 0x4a0   :  { %718 = shalt.err (!%p715_p6)
}
 0x4a1   :  { %493 = dma.vmem_to_hbm [thread:$0]  %s491_s9, 128, %s866_s10, [#allocation4]  }
 0x4a2   :  { %735 = dma.done.wait [#allocation4], 128  }
 0x4a3   :  { %736 = vsyncadd [#allocation4], 4294967168 }
 0x4a4   :  { %497 = vsyncpa [#allocation3], 1 }
 0x4a5   :  { %498 = vsyncpa [#allocation6], 1 }
 0x4a6   :  { %499 = vsyncpa [#allocation9], 1 }
 0x4a7   :  { %500 = vsyncpa [#allocation12], 1 }
 0x4a8   :  { %501 = vsyncpa [#allocation4], 1 }

// kernel: tpu_custom_call.1
= control target key start
LH: loop header
LB: loop body
LE: loop exit
PB: predicated region body
PF: predicated region fallthrough
CT: control target
= control target key end

     0   :  { %15 = vsyncpa [#allocation3], 0  ;;  %s856_s0 = inlined_call_operand.hbm [shape: f32[8,16], index: 0, kind: input, shape index: {}]   ;;  %s857_s1 = inlined_call_operand.hbm [shape: f32[8,128], index: 1, kind: input, shape index: {}]   ;;  %s858_s2 = inlined_call_operand.hbm [shape: f32[16,32], index: 2, kind: input, shape index: {}]   ;;  %s859_s3 = inlined_call_operand.vmem [shape: f32[1,32], index: 3, kind: input, shape index: {}]   ;;  %s860_s4 = inlined_call_operand.hbm [shape: f32[32,32], index: 4, kind: input, shape index: {}]   ;;  %s861_s5 = inlined_call_operand.vmem [shape: f32[1,32], index: 5, kind: input, shape index: {}]   ;;  %s862_s6 = inlined_call_operand.hbm [shape: f32[32,32], index: 6, kind: input, shape index: {}]   ;;  %s863_s7 = inlined_call_operand.vmem [shape: f32[1,32], index: 7, kind: input, shape index: {}]   ;;  %s864_s8 = inlined_call_operand.hbm [shape: f32[32,128], index: 8, kind: input, shape index: {}]   ;;  %s865_s9 = inlined_call_operand.vmem [shape: f32[1,128], index: 9, kind: input, shape index: {}]   ;;  %s866_s10 = inlined_call_operand.hbm [shape: f32[8,128], index: 10, kind: output, shape index: {}]  }
   0x1   :  { %16 = vsyncpa [#allocation6], 0 }
   0x2   :  { %17 = vsyncpa [#allocation9], 0 }
   0x3   :  { %18 = vsyncpa [#allocation12], 0 }
   0x4   :  { %19 = vsyncpa [#allocation4], 0  ;;  %s737_s13 = smov [#allocation5]  }
   0x5   :  { %s36_s14 = sshll.u32 %s737_s13, 4  ;;  %s37_s14 = int_to_ptr.vmem [resolvable:$true] %s36_s14 }
   0x6   :  { %s595_s15 = scalar_lea.vmem %s37_s14, 128  ;;  %p600_p1 = scmp.lt.s32.totalorder %s37_s14, %s37_s14 }
   0x7   :  { %p596_p0 = scmp.ne.s32.totalorder %s37_s14, %s595_s15  ;;  %p601_p2 = scmp.lt.s32.totalorder %s595_s15, %s595_s15 }
   0x9   :  { %p602_p3 = por %p601_p2, %p600_p1 }
   0xb   :  { %p603_p4 = pnand %p602_p3, %p596_p0 }
   0xd   :  { %606 = shalt.err (!%p603_p4)
}
   0xe   :  { %39 = dma.hbm_to_vmem [thread:$0]  %s857_s1, 128, %s37_s14, [#allocation6]  }
   0xf   :  { %s738_s18 = smov [#allocation8]   ;;  %s739_s20 = smov [#allocation2]  }
  0x10   :  { %s59_s19 = sshll.u32 %s738_s18, 4  ;;  %s26_s21 = sshll.u32 %s739_s20, 4  ;;  %s60_s19 = int_to_ptr.vmem [resolvable:$true] %s59_s19  ;;  %s27_s21 = int_to_ptr.vmem [resolvable:$true] %s26_s21 }
  0x11   :  { %s615_s22 = scalar_lea.vmem %s60_s19, 512  ;;  %p620_p6 = scmp.lt.s32.totalorder %s60_s19, %s60_s19 }
  0x12   :  { %p616_p5 = scmp.ne.s32.totalorder %s60_s19, %s615_s22  ;;  %p621_p7 = scmp.lt.s32.totalorder %s615_s22, %s615_s22 }
  0x14   :  { %p622_p8 = por %p621_p7, %p620_p6 }
  0x16   :  { %p623_p9 = pnand %p622_p8, %p616_p5 }
  0x18   :  { %626 = shalt.err (!%p623_p9)
}
  0x19   :  { %s740_s23 = smov 128   ;;  %s741_s24 = smov 8  }
  0x1a   :  { %65 = dma.hbm_to_vmem [thread:$0]  %s860_s4, 512, %s60_s19, [#allocation9], %s740_s23, %s740_s23, %s741_s24  }
  0x1b   :  { %s635_s1 = scalar_lea.vmem %s27_s21, 128  ;;  %p640_p11 = scmp.lt.s32.totalorder %s27_s21, %s27_s21 }
  0x1c   :  { %p636_p10 = scmp.ne.s32.totalorder %s27_s21, %s635_s1  ;;  %p641_p12 = scmp.lt.s32.totalorder %s635_s1, %s635_s1 }
  0x1e   :  { %p642_p13 = por %p641_p12, %p640_p11 }
  0x20   :  { %p643_p0 = pnand %p642_p13, %p636_p10 }
  0x22   :  { %646 = shalt.err (!%p643_p0)
}
  0x23   :  { %29 = dma.hbm_to_vmem [thread:$0]  %s856_s0, 128, %s27_s21, [#allocation3]  }
  0x24   :  { %s742_s29 = smov [#allocation7]   ;;  %s743_s11 = smov [#allocation10]  }
  0x25   :  { %s45_s30 = sshll.u32 %s742_s29, 4  ;;  %s73_s12 = sshll.u32 %s743_s11, 4  ;;  %s46_s30 = int_to_ptr.vmem [resolvable:$true] %s45_s30  ;;  %s74_s12 = int_to_ptr.vmem [resolvable:$true] %s73_s12 }
  0x26   :  { %s655_s13 = scalar_lea.vmem %s46_s30, 256  ;;  %p660_p2 = scmp.lt.s32.totalorder %s46_s30, %s46_s30 }
  0x27   :  { %p656_p1 = scmp.ne.s32.totalorder %s46_s30, %s655_s13  ;;  %p661_p3 = scmp.lt.s32.totalorder %s655_s13, %s655_s13 }
  0x29   :  { %p662_p4 = por %p661_p3, %p660_p2 }
  0x2b   :  { %p663_p5 = pnand %p662_p4, %p656_p1 }
  0x2d   :  { %666 = shalt.err (!%p663_p5)
}
  0x2e   :  { %51 = dma.hbm_to_vmem [thread:$0]  %s858_s2, 256, %s46_s30, [#allocation6], %s740_s23, %s740_s23, %s741_s24  }
  0x2f   :  { %s675_s0 = scalar_lea.vmem %s74_s12, 512  ;;  %p680_p7 = scmp.lt.s32.totalorder %s74_s12, %s74_s12 }
  0x30   :  { %p676_p6 = scmp.ne.s32.totalorder %s74_s12, %s675_s0  ;;  %p681_p8 = scmp.lt.s32.totalorder %s675_s0, %s675_s0 }
  0x32   :  { %p682_p9 = por %p681_p8, %p680_p7 }
  0x34   :  { %p683_p10 = pnand %p682_p9, %p676_p6 }
  0x36   :  { %686 = shalt.err (!%p683_p10)
}
  0x37   :  { %79 = dma.hbm_to_vmem [thread:$0]  %s862_s6, 512, %s74_s12, [#allocation9], %s740_s23, %s740_s23, %s741_s24  }
  0x38   :  { %s744_s17 = smov [#allocation11]  }
  0x39   :  { %s87_s18 = sshll.u32 %s744_s17, 4  ;;  %s88_s18 = int_to_ptr.vmem [resolvable:$true] %s87_s18 }
  0x3a   :  { %s695_s19 = scalar_lea.vmem %s88_s18, 512  ;;  %p700_p12 = scmp.lt.s32.totalorder %s88_s18, %s88_s18 }
  0x3b   :  { %p696_p11 = scmp.ne.s32.totalorder %s88_s18, %s695_s19  ;;  %p701_p13 = scmp.lt.s32.totalorder %s695_s19, %s695_s19 }
  0x3d   :  { %p702_p0 = por %p701_p13, %p700_p12 }
  0x3f   :  { %p703_p1 = pnand %p702_p0, %p696_p11 }
  0x41   :  { %706 = shalt.err (!%p703_p1)
}
  0x42   :  { %93 = dma.hbm_to_vmem [thread:$0]  %s864_s8, 512, %s88_s18, [#allocation12], %s740_s23, %s740_s23, %s741_s24  }
  0x43   :  { %727 = dma.done.wait [#allocation3], 128  }
  0x44   :  { %728 = vsyncadd [#allocation3], 4294967168 }
  0x45   :  { %729 = dma.done.wait [#allocation6], 384  }
  0x46   :  { %730 = vsyncadd [#allocation6], 4294966912 }
  0x47   :  { %731 = dma.done.wait [#allocation9], 1024  }
  0x48   :  { %732 = vsyncadd [#allocation9], 4294966272 }
  0x49   :  { %733 = dma.done.wait [#allocation12], 512  }
  0x4a   :  { %734 = vsyncadd [#allocation12], 4294966784  ;;  %v745_v0 = vmov 0.0   ;;  %vm746_vm0 = vmmov 0   ;;  %v116_v1 = vld [vmem:[#allocation7 + $0x8] sm:$0xff]  ;;  %v115_v2 = vld [vmem:[#allocation7] sm:$0xff]  ;;  %v474_v49 = vlaneseq }
  0x4b   :  { %529 = vmatprep.subr.mxu0 %v745_v0  ;;  %533 = vmatprep.mubr.msk.f32.mxu0 %vm746_vm0, %v745_v0  ;;  %v114_v3 = vld [vmem:[#allocation2] sm:$0xff]  ;;  %vm124_vm1 = vcmask 130048   ;;  %v202_v4 = vld [vmem:[#allocation8 + $0x18] sm:$0xff]  ;;  %v201_v5 = vld [vmem:[#allocation8 + $0x10] sm:$0xff]  ;;  %vm210_vm2 = vcmask 261120   ;;  %s747_s25 = smov 64  }
  0x4c   :  { %536 = vmatprep.subr.mxu1 %v745_v0  ;;  %544 = vmatprep.mubr.msk.f32.mxu1 %vm746_vm0, %v745_v0  ;;  %v200_v6 = vld [vmem:[#allocation8 + $0x8] sm:$0xff]  ;;  %v199_v7 = vld [vmem:[#allocation8] sm:$0xff]  ;;  %v288_v8 = vld [vmem:[#allocation10 + $0x18] sm:$0xff]  ;;  %v475_v52 = vand.u32 127, %v474_v49 }
  0x4d   :  { %530 = vmatpush3.msra.mxu0 %v116_v1  ;;  %537 = vmatpush3.msra.mxu1 %v202_v4  ;;  %v502_v9 = vld [vmem:[%s859_s3] ss:$0 sm:$0xff]  ;;  %v287_v14 = vld [vmem:[#allocation10 + $0x10] sm:$0xff]  ;;  %v286_v15 = vld [vmem:[#allocation10 + $0x8] sm:$0xff] }
  0x4e   :  { %531 = vmatprep.subr.mxu0 %v745_v0  ;;  %538 = vmatprep.subr.mxu1 %v745_v0  ;;  %v285_v16 = vld [vmem:[#allocation10] sm:$0xff]  ;;  %v373_v17 = vld [vmem:[#allocation11 + $0x18] sm:$0xff]  ;;  %v372_v23 = vld [vmem:[#allocation11 + $0x10] sm:$0xff]  ;;  %vm476_vm3 = vcmp.lt.s32.totalorder %v475_v52, 8  ;;  %vm481_vm4 = vcmp.eq.s32.totalorder %v475_v52, 127 }
  0x4f   :  { %532 = vmatpush3.msra.mxu0 %v115_v2  ;;  %539 = vmatpush3.msra.mxu1 %v201_v5  ;;  %v504_v18 = vld [vmem:[%s861_s5] ss:$0 sm:$0xff]  ;;  %v371_v24 = vld [vmem:[#allocation11 + $0x8] sm:$0xff] }
  0x50   :  { %534 = vmatmul.mubr.msk.f32.vlgmr.msra.gmra.mxu0 %vm124_vm1, %v114_v3  ;;  %547 = vmatprep.subr.mxu0 %v745_v0  ;;  %v370_v25 = vld [vmem:[#allocation11] sm:$0xff]  ;;  %v458_v40 = vld [vmem:[#allocation5] sm:$0xff] }
  0x51   :  { %555 = vmatprep.mubr.msk.f32.mxu0 %vm746_vm0, %v745_v0  ;;  %540 = vmatprep.subr.mxu1 %v745_v0  ;;  %v506_v26 = vld [vmem:[%s863_s7] ss:$0 sm:$0xff]  ;;  %v466_v48 = vmul.f32 %v458_v40, %v458_v40  ;;  %s748_s7 = smov [#allocation13]  }
  0x52   :  { %541 = vmatpush3.msra.mxu1 %v200_v6  ;;  %548 = vmatpush3.msra.mxu0 %v288_v8  ;;  %v508_v31 = vld [vmem:[%s865_s9] ss:$0 sm:$0xff]  ;;  %s490_s9 = sshll.u32 %s748_s7, 4  ;;  %s491_s9 = int_to_ptr.vmem [resolvable:$true] %s490_s9 }
  0x53   :  { %542 = vmatprep.subr.mxu1 %v745_v0  ;;  %549 = vmatprep.subr.mxu0 %v745_v0  ;;  %v467_v51 = vmul.f32 0.5, %v466_v48  ;;  %s707_s26 = scalar_lea.vmem %s491_s9, 128  ;;  %p712_p3 = scmp.lt.s32.totalorder %s491_s9, %s491_s9 }
  0x54   :  { %543 = vmatpush3.msra.mxu1 %v199_v7  ;;  %550 = vmatpush3.msra.mxu0 %v287_v14  ;;  %p708_p2 = scmp.ne.s32.totalorder %s491_s9, %s707_s26  ;;  %p713_p4 = scmp.lt.s32.totalorder %s707_s26, %s707_s26 }
  0x55   :  { %558 = vmatprep.subr.mxu1 %v745_v0  ;;  %551 = vmatprep.subr.mxu0 %v745_v0 }
  0x56   :  { %552 = vmatpush3.msra.mxu0 %v286_v15  ;;  %p714_p5 = por %p713_p4, %p712_p3 }
  0x57   :  { %553 = vmatprep.subr.mxu0 %v745_v0 }
  0x58   :  { %554 = vmatpush3.msra.mxu0 %v285_v16  ;;  %p715_p6 = pnand %p714_p5, %p708_p2 }
 0x110   :  { %v194_v10 = vpop.f32.mrf.mxu0 }
 0x111   :  { %v195_v11 = vadd.f32 %v502_v9, %v194_v10 }
 0x112   :  { %v535_v12 = vpop.f32.mrf.mxu0 }
 0x113   :  { %v198_v13 = vmax.f32 %v195_v11, 0.0 }
 0x115   :  { %545 = vmatmul.mubr.msk.f32.vlgmr.msra.gmra.mxu1 %vm210_vm2, %v198_v13 }
 0x116   :  { %566 = vmatprep.mubr.msk.f32.mxu1 %vm746_vm0, %v745_v0  ;;  %559 = vmatpush3.msra.mxu1 %v373_v17 }
 0x117   :  { %560 = vmatprep.subr.mxu1 %v745_v0 }
 0x118   :  { %561 = vmatpush3.msra.mxu1 %v372_v23 }
 0x119   :  { %562 = vmatprep.subr.mxu1 %v745_v0 }
 0x11a   :  { %563 = vmatpush3.msra.mxu1 %v371_v24 }
 0x11b   :  { %564 = vmatprep.subr.mxu1 %v745_v0 }
 0x11c   :  { %565 = vmatpush3.msra.mxu1 %v370_v25 }
 0x1d5   :  { %v280_v19 = vpop.f32.mrf.mxu1 }
 0x1d6   :  { %v281_v20 = vadd.f32 %v504_v18, %v280_v19 }
 0x1d7   :  { %v546_v21 = vpop.f32.mrf.mxu1 }
 0x1d8   :  { %v284_v22 = vmax.f32 %v281_v20, 0.0 }
 0x1da   :  { %556 = vmatmul.mubr.msk.f32.vlgmr.msra.gmra.mxu0 %vm210_vm2, %v284_v22 }
 0x29a   :  { %v365_v27 = vpop.f32.mrf.mxu0 }
 0x29b   :  { %v366_v28 = vadd.f32 %v506_v26, %v365_v27 }
 0x29c   :  { %v557_v29 = vpop.f32.mrf.mxu0 }
 0x29d   :  { %v369_v30 = vmax.f32 %v366_v28, 0.0 }
 0x29f   :  { %567 = vmatmul.mubr.msk.f32.vlgmr.msra.gmra.mxu1 %vm210_vm2, %v369_v30 }
 0x35f   :  { %v450_v32 = vpop.f32.mrf.mxu1 }
 0x360   :  { %v451_v33 = vadd.f32 %v508_v31, %v450_v32 }
 0x361   :  { %v568_v34 = vpop.f32.mrf.mxu1 }
 0x362   :  { %454 = vrot.lane.b32.xlu0 %v451_v33, %s747_s25 }
 0x3d4   :  { %v455_v35 = vpop.permute.xlu0 %454 }
 0x3d5   :  { %v456_v36 = vmax.f32 %v455_v35, -5.0 }
 0x3d7   :  { %v457_v37 = vmin.f32 %v456_v36, 2.0 }
 0x3d9   :  { %v459_v38 = vmul.f32 1.442695, %v457_v37  ;;  %v464_v47 = vsub.f32 0.0, %v457_v37 }
 0x3db   :  { %581 = vpow2.f32 %v459_v38  ;;  %v510_v50 = vadd.f32 -0.9189385, %v464_v47 }
 0x3dd   :  { %v468_v54 = vsub.f32 %v510_v50, %v467_v51 }
 0x3e8   :  { %v582_v39 = vpop.eup %581 }
 0x3e9   :  { %v461_v41 = vmul.f32 %v582_v39, %v458_v40 }
 0x3eb   :  { %v462_v42 = vadd.f32 %v461_v41, %v451_v33 }
 0x3ed   :  { %583 = vtanh.f32 %v462_v42 }
 0x3fa   :  { %v584_v43 = vpop.eup %583 }
 0x3fb   :  { %v469_v44 = vmul.f32 %v584_v43, %v584_v43 }
 0x3fd   :  { %v470_v45 = vsub.f32 1.0, %v469_v44 }
 0x3ff   :  { %v471_v46 = vadd.f32 1e-06, %v470_v45 }
 0x401   :  { %585 = vlog2.f32 %v471_v46 }
 0x40e   :  { %v586_v53 = vpop.eup %585 }
 0x40f   :  { %v473_v55 = vmul.f32 0.6931472, %v586_v53 }
 0x411   :  { %v477_v56 = vsub.f32 %v468_v54, %v473_v55 }
 0x413   :  { %v478_v57 = vsel %vm476_vm3, %v477_v56, 0.0 }
 0x414   :  { %479 = vadd.xlane.f32.xlu0 %v478_v57 }
 0x49d   :  { %v480_v58 = vpop.xlane.xlu0 %479 }
 0x49e   :  { %v482_v59 = vsel %vm481_vm4, %v480_v58, %v584_v43 }
 0x49f   :  { %483 = vst [vmem:[#allocation13] sm:$0xff] %v482_v59 }
 0x4a0   :  { %718 = shalt.err (!%p715_p6)
}
 0x4a1   :  { %493 = dma.vmem_to_hbm [thread:$0]  %s491_s9, 128, %s866_s10, [#allocation4]  }
 0x4a2   :  { %735 = dma.done.wait [#allocation4], 128  }
 0x4a3   :  { %736 = vsyncadd [#allocation4], 4294967168 }
 0x4a4   :  { %497 = vsyncpa [#allocation3], 1 }
 0x4a5   :  { %498 = vsyncpa [#allocation6], 1 }
 0x4a6   :  { %499 = vsyncpa [#allocation9], 1 }
 0x4a7   :  { %500 = vsyncpa [#allocation12], 1 }
 0x4a8   :  { %501 = vsyncpa [#allocation4], 1 }

</bundles_post_ra>
